<compile_context>
chip_gen: v7x
topology: tpu7x:2x2x1
jax: 0.10.0
libtpu: 0.0.40
codegen_flags: <defaults>
</compile_context>

<pallas_src>
import functools

import jax
import jax.numpy as jnp
from jax.experimental import pallas as pl
from jax.experimental.pallas import tpu as pltpu


_LANES = 128
_TARGET_BLOCK_BYTES = 4 * 1024 * 1024   # ~4 MiB input tile amortizes the ~0.35us/step overhead
_MIN_SPLIT_BYTES = 2 * 1024 * 1024      # only force a >=4-step grid when each step stays >=512 KiB


@functools.lru_cache(maxsize=1)
def _vmem_limit_bytes() -> int:
    """Generation-aware scoped-VMEM budget.

    v5e/v6e have 128 MiB physical VMEM, v7x only 64 MiB. Use ~half of physical as
    the plan budget and never assume more than 64 MiB (so tiles sized here can
    never OOM a v7x part).
    """
    try:
        phys = int(getattr(pltpu.get_tpu_info(), "vmem_capacity_bytes", 0)) or (64 << 20)
    except Exception:  # interpret mode / non-TPU query failure
        phys = 64 << 20
    return int(max(16 << 20, min(64 << 20, phys // 2)))


def _sublane_align(dtype) -> int:
    # f32 -> 8, bf16 -> 16, int8/fp8 -> 32 (sub-32-bit dtypes pack along sublanes).
    return max(8, 32 // jnp.dtype(dtype).itemsize)


def _round_up(x: int, m: int) -> int:
    return ((x + m - 1) // m) * m


def _pick_row_tile(n_rows: int, lane: int, dtype, vmem_limit: int) -> int:
    """Largest row tile whose full VMEM plan (double-buffered in/out blocks plus the
    in-kernel f32 temporaries x / xc / xc*xc) fits comfortably in the budget."""
    itemsize = jnp.dtype(dtype).itemsize
    align = _sublane_align(dtype)

    per_row_plan = lane * (4 * itemsize + 12)        # 2x in + 2x out + 3 f32 temps
    rows_by_vmem = max(align, int((vmem_limit * 3 // 4) // per_row_plan))
    rows_by_target = max(align, _TARGET_BLOCK_BYTES // (lane * itemsize))
    t = min(rows_by_vmem, rows_by_target)

    # Target >= 4 grid steps (>= 2 per TensorCore on megacore parts) when the array
    # is big enough for the split to beat the per-step overhead.
    if n_rows * lane * itemsize >= _MIN_SPLIT_BYTES:
        t = min(t, _round_up(pl.cdiv(n_rows, 4), align))

    if t >= n_rows:
        return int(n_rows)                            # single full-array block (layout-legal)
    return int(max(align, (t // align) * align))


def _group_sum_matrix(d: int):
    """128x128 block-diagonal 0/1 matrix: x @ g sums (and broadcasts back) each group
    of d consecutive lanes. Exact in bf16, so DEFAULT matmul precision is safe."""
    idx = jnp.arange(_LANES)
    return (idx[:, None] // d == idx[None, :] // d).astype(jnp.float32)


def _norm_kernel(x_ref, o_ref, *, eps: float, inv_dm1: float):
    """General path: block is (row_tile, d); reduce over the last axis (XLU)."""
    x = x_ref[...].astype(jnp.float32)
    mean = jnp.mean(x, axis=-1, keepdims=True)
    xc = x - mean
    var = jnp.sum(xc * xc, axis=-1, keepdims=True) * inv_dm1   # unbiased (ddof=1)
    inv = pl.reciprocal(jnp.sqrt(var) + eps, approx=False)     # exact, per row only
    o_ref[...] = (xc * inv).astype(o_ref.dtype)


def _norm_kernel_packed(x_ref, g_ref, o_ref, *, eps: float, d: int):
    """Lane-dense path: block is (row_tile, 128); each group of d consecutive lanes is
    one logical row. Segmented lane reductions run on the otherwise-idle MXU via the
    hoisted 0/1 block-diagonal matrix g (single-pass / DEFAULT precision)."""
    x = x_ref[...].astype(jnp.float32)
    g = g_ref[...]
    gsum = jnp.dot(x, g, preferred_element_type=jnp.float32)
    mean = gsum * (1.0 / d)
    xc = x - mean
    sq = jnp.dot(xc * xc, g, preferred_element_type=jnp.float32)
    var = sq * (1.0 / (d - 1))                                  # unbiased (ddof=1)
    inv = pl.reciprocal(jnp.sqrt(var) + eps, approx=False)      # exact, per row only
    o_ref[...] = (xc * inv).astype(o_ref.dtype)


def _run_norm(xk, kernel, extra_inputs, extra_specs, vmem_limit):
    n_rows, lane = xk.shape
    row_tile = _pick_row_tile(n_rows, lane, xk.dtype, vmem_limit)
    grid = (pl.cdiv(n_rows, row_tile),)  # partial last block: OOB reads are per-row
                                         # garbage, OOB writes are masked by Pallas.
    return pl.pallas_call(
        kernel,
        out_shape=jax.ShapeDtypeStruct((n_rows, lane), xk.dtype),
        grid_spec=pltpu.PrefetchScalarGridSpec(
            num_scalar_prefetch=0,
            grid=grid,
            in_specs=[pl.BlockSpec((row_tile, lane), lambda i: (i, 0))] + list(extra_specs),
            out_specs=pl.BlockSpec((row_tile, lane), lambda i: (i, 0)),
        ),
        compiler_params=pltpu.CompilerParams(
            dimension_semantics=("parallel",),
            vmem_limit_bytes=vmem_limit,
        ),
    )(xk, *extra_inputs)


def _norm_general(x2, d: int, eps: float, vmem_limit: int):
    kernel = functools.partial(_norm_kernel, eps=eps, inv_dm1=1.0 / (d - 1))
    return _run_norm(x2, kernel, [], [], vmem_limit)


def _norm_packed(x2, d: int, eps: float, vmem_limit: int):
    rows = x2.shape[0]
    pack = _LANES // d
    # Bit-identical row-major view: (rows, d) -> (rows/pack, 128). No HBM data movement.
    xk = x2.reshape(rows // pack, _LANES)
    g = _group_sum_matrix(d)  # built once on the host, DMA'd once (constant index_map)
    kernel = functools.partial(_norm_kernel_packed, eps=eps, d=d)
    g_spec = pl.BlockSpec((_LANES, _LANES), lambda i: (0, 0))
    out = _run_norm(xk, kernel, [g], [g_spec], vmem_limit)
    return out.reshape(rows, d)


def norm_layer(x, eps: float = 1e-6):
    """(x - mean) / (std + eps) over the last axis, as a Pallas TPU kernel."""
    orig_shape = x.shape
    d = int(orig_shape[-1])
    if d < 2:
        raise ValueError("d_model must be >= 2 (torch.std's unbiased estimator divides by d-1)")

    x2 = x.reshape(-1, d)
    rows = x2.shape[0]
    vmem_limit = _vmem_limit_bytes()

    pack = _LANES // d if (d < _LANES and _LANES % d == 0) else 1
    if pack > 1:
        bulk = (rows // pack) * pack
        if bulk == rows:
            out2 = _norm_packed(x2, d, eps, vmem_limit)
        elif bulk == 0:
            out2 = _norm_general(x2, d, eps, vmem_limit)
        else:
            # Lane-dense packed path for the bulk, tiny general kernel for the
            # (< pack rows) remainder, instead of lane-sparse stores for everything.
            out_bulk = _norm_packed(x2[:bulk], d, eps, vmem_limit)
            out_tail = _norm_general(x2[bulk:], d, eps, vmem_limit)
            out2 = jnp.concatenate([out_bulk, out_tail], axis=0)
    else:
        out2 = _norm_general(x2, d, eps, vmem_limit)

    return out2.reshape(orig_shape)


class NormLayerPallas:
    """Mirror of the PyTorch NormLayer module (alpha/bias unused in forward, as in reference)."""

    def __init__(self, d_model, eps=1e-6):
        self.size = d_model
        self.alpha = jnp.ones((d_model,), jnp.float32)  # declared but unused in forward
        self.bias = jnp.zeros((d_model,), jnp.float32)  # declared but unused in forward
        self.eps = eps

    def __call__(self, x):
        return norm_layer(x, eps=self.eps)


if __name__ == "__main__":
    key = jax.random.PRNGKey(0)
    k1, k2, k3 = jax.random.split(key, 3)

    def reference(x, eps=1e-6):
        mean = jnp.mean(x, axis=-1, keepdims=True)
        std = jnp.std(x, axis=-1, keepdims=True, ddof=1)  # unbiased, matches torch.std
        return (x - mean) / (std + eps)

    # 1) Packed (lane-dense) path: d_model=32 < 128, rows divisible by pack (=4).
    batch, seq, d_model = 2, 8, 32
    x = jax.random.normal(k1, (batch, seq, d_model), dtype=jnp.float32)
    layer = NormLayerPallas(d_model)
    out = jax.block_until_ready(layer(x))
    assert out.shape == x.shape
    err = float(jnp.max(jnp.abs(out - reference(x))))
    # Single-pass (bf16) MXU group sums on hardware => ~1e-3-level error bound.
    assert err < 5e-3, f"packed path max abs err {err}"

    # 2) General path: d_model=160 >= 128 (pure f32 math, tight tolerance).
    x2 = jax.random.normal(k2, (2, 5, 160), dtype=jnp.float32)
    out2 = jax.block_until_ready(norm_layer(x2))
    assert out2.shape == x2.shape
    err2 = float(jnp.max(jnp.abs(out2 - reference(x2))))
    assert err2 < 1e-3, f"general path max abs err {err2}"

    # 3) Packed bulk + tiny general tail: rows (2*7=14) not a multiple of pack (4).
    x3 = jax.random.normal(k3, (2, 7, d_model), dtype=jnp.float32)
    out3 = jax.block_until_ready(norm_layer(x3))
    assert out3.shape == x3.shape
    err3 = float(jnp.max(jnp.abs(out3 - reference(x3))))
    assert err3 < 5e-3, f"bulk+tail path max abs err {err3}"

    print("KERNEL_OK")
</pallas_src>

<mosaic_0001>
module attributes {stable_mosaic.version = 11 : i64} {
  func.func @_norm_kernel_packed(%arg0: i32, %arg1: memref<4x128xf32, #tpu.memory_space<vmem>>, %arg2: memref<128x128xf32, #tpu.memory_space<vmem>>, %arg3: memref<4x128xf32, #tpu.memory_space<vmem>>) attributes {dimension_semantics = [#tpu.dimension_semantics<parallel>], iteration_bounds = array<i64: 1>, scalar_prefetch = 0 : i64, scratch_operands = 0 : i64, tpu.core_type = #tpu.core_type<tc>, window_params = [{transform_indices = @transform_0, window_bounds = array<i64: 4, 128>}, {pipeline_mode = #tpu.pipeline_mode<synchronous>, transform_indices = @transform_1, window_bounds = array<i64: 128, 128>}, {transform_indices = @transform_2, window_bounds = array<i64: 4, 128>}]} {
    %c0 = arith.constant 0 : index
    %c0_0 = arith.constant 0 : index
    %0 = vector.load %arg1[%c0, %c0_0] : memref<4x128xf32, #tpu.memory_space<vmem>>, vector<4x128xf32>
    %c0_1 = arith.constant 0 : index
    %c0_2 = arith.constant 0 : index
    %1 = vector.load %arg2[%c0_1, %c0_2] : memref<128x128xf32, #tpu.memory_space<vmem>>, vector<128x128xf32>
    %cst = arith.constant dense<0.000000e+00> : vector<4x128xf32>
    %2 = tpu.matmul %0, %1, %cst {dimension_numbers = #tpu.dot_dimension_numbers<[1], [0], [0], [1], [0, 0, 1, 1], [], []>} : vector<4x128xf32>, vector<128x128xf32>, vector<4x128xf32> -> vector<4x128xf32>
    %cst_3 = arith.constant 3.125000e-02 : f32
    %3 = vector.broadcast %cst_3 : f32 to vector<4x128xf32>
    %4 = arith.mulf %2, %3 : vector<4x128xf32>
    %5 = arith.subf %0, %4 : vector<4x128xf32>
    %6 = arith.mulf %5, %5 : vector<4x128xf32>
    %cst_4 = arith.constant dense<0.000000e+00> : vector<4x128xf32>
    %7 = tpu.matmul %6, %1, %cst_4 {dimension_numbers = #tpu.dot_dimension_numbers<[1], [0], [0], [1], [0, 0, 1, 1], [], []>} : vector<4x128xf32>, vector<128x128xf32>, vector<4x128xf32> -> vector<4x128xf32>
    %cst_5 = arith.constant 0.0322580636 : f32
    %8 = vector.broadcast %cst_5 : f32 to vector<4x128xf32>
    %9 = arith.mulf %7, %8 : vector<4x128xf32>
    %10 = math.sqrt %9 : vector<4x128xf32>
    %cst_6 = arith.constant 9.99999997E-7 : f32
    %11 = vector.broadcast %cst_6 : f32 to vector<4x128xf32>
    %12 = arith.addf %10, %11 : vector<4x128xf32>
    %13 = tpu.reciprocal %12 : vector<4x128xf32> -> vector<4x128xf32>
    %14 = arith.mulf %5, %13 : vector<4x128xf32>
    %c0_7 = arith.constant 0 : index
    %c0_8 = arith.constant 0 : index
    %15 = vector.load %arg3[%c0_7, %c0_8] : memref<4x128xf32, #tpu.memory_space<vmem>>, vector<4x128xf32>
    tpu.vector_store %arg3[%c0_7, %c0_8], %14 {strides = array<i32>} : memref<4x128xf32, #tpu.memory_space<vmem>>, vector<4x128xf32>,
    return
  }
  func.func @transform_0(%arg0: i32) -> (i32, i32) {
    %c0_i32 = arith.constant 0 : i32
    %c0_i32_0 = arith.constant 0 : i32
    return %arg0, %c0_i32 : i32, i32
  }
  func.func @transform_1(%arg0: i32) -> (i32, i32) {
    %c0_i32 = arith.constant 0 : i32
    %c0_i32_0 = arith.constant 0 : i32
    %c0_i32_1 = arith.constant 0 : i32
    return %c0_i32, %c0_i32_0 : i32, i32
  }
  func.func @transform_2(%arg0: i32) -> (i32, i32) {
    %c0_i32 = arith.constant 0 : i32
    %c0_i32_0 = arith.constant 0 : i32
    return %arg0, %c0_i32 : i32, i32
  }
}

</mosaic_0001>

<bundles_post_ra>
// kernel: tpu_custom_call.1
= control target key start
LH: loop header
LB: loop body
LE: loop exit
PB: predicated region body
PF: predicated region fallthrough
CT: control target
= control target key end

     0   :  { %7 = vsyncpa [#allocation3], 0  ;;  %s528_s0 = inlined_call_operand.hbm [shape: f32[4,128], index: 0, kind: input, shape index: {}]   ;;  %s529_s1 = inlined_call_operand.hbm [shape: f32[128,128], index: 1, kind: input, shape index: {}]   ;;  %s530_s2 = inlined_call_operand.hbm [shape: f32[4,128], index: 2, kind: output, shape index: {}]  }
   0x1   :  { %8 = vsyncpa [#allocation6], 0 }
   0x2   :  { %9 = vsyncpa [#allocation4], 0  ;;  %s462_s9 = smov [#allocation2]   ;;  %s463_s11 = smov [#allocation5]  }
   0x3   :  { %s16_s10 = sshll.u32 %s462_s9, 4  ;;  %s25_s12 = sshll.u32 %s463_s11, 4  ;;  %s17_s10 = int_to_ptr.vmem [resolvable:$true] %s16_s10  ;;  %s485_s12 = int_to_ptr.vmem [resolvable:$true] %s25_s12 }
   0x4   :  { %s390_s15 = scalar_lea.hbm %s528_s0, 64 }
   0x5   :  { %p391_p0 = scmp.ne.s32.totalorder %s528_s0, %s390_s15  ;;  %p394_p1 = scmp.lt.u32.totalorder %s390_s15, %s528_s0 }
   0x7   :  { %p396_p2 = pnand %p394_p1, %p391_p0 }
   0x9   :  { %399 = shalt.err (!%p396_p2)
}
   0xa   :  { %s400_s20 = scalar_lea.vmem %s17_s10, 64  ;;  %p405_p4 = scmp.lt.s32.totalorder %s17_s10, %s17_s10 }
   0xb   :  { %p401_p3 = scmp.ne.s32.totalorder %s17_s10, %s400_s20  ;;  %p406_p5 = scmp.lt.s32.totalorder %s400_s20, %s400_s20 }
   0xd   :  { %p407_p6 = por %p406_p5, %p405_p4 }
   0xf   :  { %p408_p7 = pnand %p407_p6, %p401_p3 }
  0x11   :  { %411 = shalt.err (!%p408_p7)
}
  0x12   :  { %19 = dma.hbm_to_vmem [thread:$0]  %s528_s0, 64, %s17_s10, [#allocation3]  }
  0x13   :  { %s412_s25 = scalar_lea.hbm %s529_s1, 2048 }
  0x14   :  { %p413_p8 = scmp.ne.s32.totalorder %s529_s1, %s412_s25  ;;  %p416_p9 = scmp.lt.u32.totalorder %s412_s25, %s529_s1 }
  0x16   :  { %p418_p10 = pnand %p416_p9, %p413_p8 }
  0x18   :  { %421 = shalt.err (!%p418_p10)
}
  0x19   :  { %s422_s30 = scalar_lea.vmem %s485_s12, 2048  ;;  %p427_p12 = scmp.lt.s32.totalorder %s485_s12, %s485_s12 }
  0x1a   :  { %p423_p11 = scmp.ne.s32.totalorder %s485_s12, %s422_s30  ;;  %p428_p13 = scmp.lt.s32.totalorder %s422_s30, %s422_s30 }
  0x1c   :  { %p429_p0 = por %p428_p13, %p427_p12 }
  0x1e   :  { %p430_p1 = pnand %p429_p0, %p423_p11 }
  0x20   :  { %433 = shalt.err (!%p430_p1)
}
  0x21   :  { %s464_s0 = smov 128   ;;  %s465_s3 = smov 8  }
  0x22   :  { %31 = dma.hbm_to_vmem [thread:$0]  %s529_s1, 2048, %s485_s12, [#allocation6], %s464_s0, %s464_s0, %s465_s3  }
  0x23   :  { %456 = dma.done.wait [#allocation3], 64  }
  0x24   :  { %457 = vsyncadd [#allocation3], 4294967232 }
  0x25   :  { %458 = dma.done.wait [#allocation6], 2048  }
  0x26   :  { %459 = vsyncadd [#allocation6], 4294965248  ;;  %v466_v0 = vmov 0.0|0.0   ;;  %vm467_vm0 = vmmov 0   ;;  %v468_v1 = vmov 0.0   ;;  %v39_v2 = vld [vmem:[#allocation5] sm:$0xff] }
  0x27   :  { %330 = vmatprep.subr.bf16.mxu0 %v466_v0  ;;  %292 = vmatprep.mubr.msk.f32.mxu0 %vm467_vm0, %v468_v1  ;;  %v40_v3 = vld [vmem:[#allocation5 + $0x8] sm:$0xff]  ;;  %v41_v4 = vld [vmem:[#allocation5 + $0x10] sm:$0xff]  ;;  %v42_v6 = vld [vmem:[#allocation5 + $0x18] sm:$0xff]  ;;  %s469_s1 = smov [#allocation7]  }
  0x28   :  { %354 = vmatprep.subr.bf16.mxu1 %v466_v0  ;;  %327 = vmatprep.mubr.msk.f32.mxu1 %vm467_vm0, %v468_v1  ;;  %v331_v5 = vpack.c.bf16 %v40_v3, %v39_v2  ;;  %v334_v7 = vpack.c.bf16 %v42_v6, %v41_v4  ;;  %v43_v8 = vld [vmem:[#allocation5 + $0x20] sm:$0xff]  ;;  %v44_v9 = vld [vmem:[#allocation5 + $0x28] sm:$0xff]  ;;  %v45_v11 = vld [vmem:[#allocation5 + $0x30] sm:$0xff]  ;;  %s216_s6 = sshll.u32 %s469_s1, 4  ;;  %s217_s6 = int_to_ptr.vmem [resolvable:$true] %s216_s6 }
  0x29   :  { %v337_v10 = vpack.c.bf16 %v44_v9, %v43_v8  ;;  %v46_v12 = vld [vmem:[#allocation5 + $0x38] sm:$0xff]  ;;  %v47_v14 = vld [vmem:[#allocation5 + $0x40] sm:$0xff]  ;;  %v48_v15 = vld [vmem:[#allocation5 + $0x48] sm:$0xff]  ;;  %s434_s7 = scalar_lea.vmem %s217_s6, 64  ;;  %p439_p3 = scmp.lt.s32.totalorder %s217_s6, %s217_s6 }
  0x2a   :  { %332 = vmatpush3.bf16.msra.mxu0 %v331_v5  ;;  %356 = vmatpush3.bf16.msra.mxu1 %v331_v5  ;;  %v340_v13 = vpack.c.bf16 %v46_v12, %v45_v11  ;;  %v343_v16 = vpack.c.bf16 %v48_v15, %v47_v14  ;;  %v49_v17 = vld [vmem:[#allocation5 + $0x50] sm:$0xff]  ;;  %v50_v18 = vld [vmem:[#allocation5 + $0x58] sm:$0xff]  ;;  %v51_v20 = vld [vmem:[#allocation5 + $0x60] sm:$0xff]  ;;  %p435_p2 = scmp.ne.s32.totalorder %s217_s6, %s434_s7  ;;  %p440_p4 = scmp.lt.s32.totalorder %s434_s7, %s434_s7 }
  0x2b   :  { %333 = vmatprep.subr.bf16.mxu0 %v466_v0  ;;  %357 = vmatprep.subr.bf16.mxu1 %v466_v0  ;;  %v346_v19 = vpack.c.bf16 %v50_v18, %v49_v17  ;;  %v52_v21 = vld [vmem:[#allocation5 + $0x68] sm:$0xff]  ;;  %v53_v23 = vld [vmem:[#allocation5 + $0x70] sm:$0xff]  ;;  %v54_v24 = vld [vmem:[#allocation5 + $0x78] sm:$0xff] }
  0x2c   :  { %v349_v22 = vpack.c.bf16 %v52_v21, %v51_v20  ;;  %v352_v25 = vpack.c.bf16 %v54_v24, %v53_v23  ;;  %v38_v26 = vld [vmem:[#allocation2] sm:$0xf]  ;;  %p441_p5 = por %p440_p4, %p439_p3 }
  0x2e   :  { %335 = vmatpush3.bf16.msra.mxu0 %v334_v7  ;;  %359 = vmatpush3.bf16.msra.mxu1 %v334_v7  ;;  %p442_p6 = pnand %p441_p5, %p435_p2 }
  0x2f   :  { %336 = vmatprep.subr.bf16.mxu0 %v466_v0  ;;  %360 = vmatprep.subr.bf16.mxu1 %v466_v0 }
  0x32   :  { %338 = vmatpush3.bf16.msra.mxu0 %v337_v10  ;;  %362 = vmatpush3.bf16.msra.mxu1 %v337_v10 }
  0x33   :  { %339 = vmatprep.subr.bf16.mxu0 %v466_v0  ;;  %363 = vmatprep.subr.bf16.mxu1 %v466_v0 }
  0x36   :  { %341 = vmatpush3.bf16.msra.mxu0 %v340_v13  ;;  %365 = vmatpush3.bf16.msra.mxu1 %v340_v13 }
  0x37   :  { %342 = vmatprep.subr.bf16.mxu0 %v466_v0  ;;  %366 = vmatprep.subr.bf16.mxu1 %v466_v0 }
  0x3a   :  { %344 = vmatpush3.bf16.msra.mxu0 %v343_v16  ;;  %368 = vmatpush3.bf16.msra.mxu1 %v343_v16 }
  0x3b   :  { %345 = vmatprep.subr.bf16.mxu0 %v466_v0  ;;  %369 = vmatprep.subr.bf16.mxu1 %v466_v0 }
  0x3e   :  { %347 = vmatpush3.bf16.msra.mxu0 %v346_v19  ;;  %371 = vmatpush3.bf16.msra.mxu1 %v346_v19 }
  0x3f   :  { %348 = vmatprep.subr.bf16.mxu0 %v466_v0  ;;  %372 = vmatprep.subr.bf16.mxu1 %v466_v0 }
  0x42   :  { %350 = vmatpush3.bf16.msra.mxu0 %v349_v22  ;;  %374 = vmatpush3.bf16.msra.mxu1 %v349_v22 }
  0x43   :  { %351 = vmatprep.subr.bf16.mxu0 %v466_v0  ;;  %375 = vmatprep.subr.bf16.mxu1 %v466_v0 }
  0x46   :  { %353 = vmatpush3.bf16.msra.mxu0 %v352_v25  ;;  %377 = vmatpush3.bf16.msra.mxu1 %v352_v25 }
  0x49   :  { %293 = vmatmul.mubr.f32.vlgmr.msra.gmra.mrb[0].mxu0 %v38_v26 }
 0x11c   :  { %v121_v27 = vpop.f32.mrb[0].mxu0 }
 0x11d   :  { %v125_v28 = vmul.f32 0.03125, %v121_v27  ;;  %v294_v29 = vpop.f32.mrb[1].mxu0 }
 0x11f   :  { %v126_v30 = vsub.f32 %v38_v26, %v125_v28 }
 0x121   :  { %v127_v31 = vmul.f32 %v126_v30, %v126_v30 }
 0x123   :  { %328 = vmatmul.mubr.f32.vlgmr.msra.gmra.mrb[0].mxu1 %v127_v31 }
 0x1f6   :  { %v194_v32 = vpop.f32.mrb[0].mxu1 }
 0x1f7   :  { %v198_v33 = vmul.f32 0.032258064, %v194_v32  ;;  %v329_v34 = vpop.f32.mrb[1].mxu1 }
 0x1f9   :  { %386 = vrsqrt.f32 %v198_v33  ;;  %vm201_vm1 = vcmp.eq.f32.partialorder %v198_v33, inf  ;;  %v204_v37 = vand.u32 2147483648, %v198_v33  ;;  %vm203_vm2 = vcmp.eq.f32.partialorder %v198_v33, 0.0 }
 0x203   :  { %v387_v35 = vpop.eup %386 }
 0x204   :  { %v200_v36 = vmul.f32 %v387_v35, %v198_v33 }
 0x206   :  { %v202_v38 = vsel %vm201_vm1, %v198_v33, %v200_v36 }
 0x207   :  { %v205_v39 = vsel %vm203_vm2, %v204_v37, %v202_v38 }
 0x208   :  { %v206_v40 = vadd.f32 1e-06, %v205_v39 }
 0x20a   :  { %388 = vrcp.f32 %v206_v40 }
 0x214   :  { %v389_v41 = vpop.eup %388 }
 0x215   :  { %v208_v42 = vmul.f32 %v389_v41, %v126_v30 }
 0x217   :  { %209 = vst [vmem:[#allocation7] sm:$0xf] %v208_v42 }
 0x218   :  { %445 = shalt.err (!%p442_p6)
}
 0x219   :  { %s446_s10 = scalar_lea.hbm %s530_s2, 64 }
 0x21a   :  { %p447_p7 = scmp.ne.s32.totalorder %s530_s2, %s446_s10  ;;  %p450_p8 = scmp.lt.u32.totalorder %s446_s10, %s530_s2 }
 0x21c   :  { %p452_p9 = pnand %p450_p8, %p447_p7 }
 0x21e   :  { %455 = shalt.err (!%p452_p9)
}
 0x21f   :  { %219 = dma.vmem_to_hbm [thread:$0]  %s217_s6, 64, %s530_s2, [#allocation4]  }
 0x220   :  { %460 = dma.done.wait [#allocation4], 64  }
 0x221   :  { %461 = vsyncadd [#allocation4], 4294967232 }
 0x222   :  { %223 = vsyncpa [#allocation3], 1 }
 0x223   :  { %224 = vsyncpa [#allocation6], 1 }
 0x224   :  { %225 = vsyncpa [#allocation4], 1 }

</bundles_post_ra>
